<compile_context>
chip_gen: v7x
topology: tpu7x:2x2x1
jax: 0.10.0
libtpu: 0.0.40
codegen_flags: <defaults>
</compile_context>

<pallas_src>
import functools

import jax
import jax.numpy as jnp
from jax.experimental import pallas as pl
from jax.experimental.pallas import tpu as pltpu

_LANE = 128   # vreg lane width; each action's atom block is padded to this
_HIDDEN = 128


def _rainbow_kernel(x_ref, w1_ref, b1_ref, w2_ref, b2_ref, wh_ref, bh_ref,
                    out_ref, *, action_dim, atom_size):
    # fc1 + ReLU   (bf16 operands, f32 accumulate)
    h1 = jnp.dot(x_ref[...], w1_ref[...], preferred_element_type=jnp.float32)
    h1 = jnp.maximum(h1 + b1_ref[...], 0.0)

    # fc2 + ReLU
    h2 = jnp.dot(h1.astype(jnp.bfloat16), w2_ref[...],
                 preferred_element_type=jnp.float32)
    h2 = jnp.maximum(h2 + b2_ref[...], 0.0)

    # Fused advantage+value head: [TILE_B, (A+1)*128]; each 128-lane block is
    # one action's (padded) atom vector; last block is the value head.
    head = jnp.dot(h2.astype(jnp.bfloat16), wh_ref[...],
                   preferred_element_type=jnp.float32)
    head = head + bh_ref[...]

    val = head[:, action_dim * _LANE:(action_dim + 1) * _LANE]      # [TB, 128]
    adv = [head[:, a * _LANE:(a + 1) * _LANE] for a in range(action_dim)]

    adv_sum = adv[0]
    for a in range(1, action_dim):
        adv_sum = adv_sum + adv[a]
    # Hoisted dueling-combine base: val - mean_a(adv)
    base = val - adv_sum * (1.0 / action_dim)

    tb = out_ref.shape[0]
    lane = jax.lax.broadcasted_iota(jnp.int32, (tb, _LANE), 1)
    valid = lane < atom_size                 # mask out zero-padded atom lanes
    neg_big = jnp.float32(-1e30)

    for a in range(action_dim):
        q = base + adv[a]                                    # dueling combine
        m = jnp.max(jnp.where(valid, q, neg_big), axis=-1, keepdims=True)
        e = jnp.where(valid, jnp.exp(q - m), 0.0)            # padded lanes -> 0
        s = jnp.sum(e, axis=-1, keepdims=True)
        p = e / s                    # exact divide: distributions sum to 1
        # full 128-lane, lane-aligned unmasked store
        out_ref[:, a * _LANE:(a + 1) * _LANE] = p


def pack_head_params(params, *, action_dim, atom_size):
    """Pack params for the kernel:
       - adv/value heads fused into one lane-aligned [hidden, (A+1)*128] matrix
       - w1 zero-padded along K to a multiple of 128
       - all matmul weights cast to bf16 (biases stay f32)."""
    hidden = params["wa"].shape[0]
    state_dim = params["w1"].shape[0]
    pad = _LANE - atom_size
    k_pad = ((state_dim + _LANE - 1) // _LANE) * _LANE

    wa3 = params["wa"].reshape(hidden, action_dim, atom_size)
    wa3 = jnp.pad(wa3, ((0, 0), (0, 0), (0, pad)))
    wa_packed = wa3.reshape(hidden, action_dim * _LANE)
    wv_packed = jnp.pad(params["wv"], ((0, 0), (0, pad)))
    wh = jnp.concatenate([wa_packed, wv_packed], axis=1)

    ba3 = params["ba"].reshape(1, action_dim, atom_size)
    ba3 = jnp.pad(ba3, ((0, 0), (0, 0), (0, pad)))
    ba_packed = ba3.reshape(1, action_dim * _LANE)
    bv_packed = jnp.pad(params["bv"], ((0, 0), (0, pad)))
    bh = jnp.concatenate([ba_packed, bv_packed], axis=1)

    w1 = jnp.pad(params["w1"], ((0, k_pad - state_dim), (0, 0)))

    return {"w1": w1.astype(jnp.bfloat16), "b1": params["b1"],
            "w2": params["w2"].astype(jnp.bfloat16), "b2": params["b2"],
            "wh": wh.astype(jnp.bfloat16), "bh": bh}


def _pick_tile_b(B):
    if B <= 16:
        return max(8, ((B + 7) // 8) * 8)       # one small tile
    # Target large tiles (per-step overhead ~0.35us, DMA efficiency), but keep
    # >= 2 grid steps so the "parallel" batch axis shards across v7x's 2 TCs.
    half = -(-B // 2)
    return min(1024, ((half + 15) // 16) * 16)


def rainbow_dqn_forward(x, packed, *, action_dim, atom_size, tile_b=None):
    B, state_dim = x.shape
    k_pad = packed["w1"].shape[0]

    if tile_b is None:
        tile_b = _pick_tile_b(B)
    B_pad = ((B + tile_b - 1) // tile_b) * tile_b

    # Zero-pad state_dim to the full 128-lane K and batch to the tile size,
    # and cast to bf16 (the matmul operand dtype) in one pass.
    x = jnp.pad(x, ((0, B_pad - B), (0, k_pad - state_dim))).astype(jnp.bfloat16)

    out_cols = action_dim * _LANE
    kernel = functools.partial(_rainbow_kernel,
                               action_dim=action_dim, atom_size=atom_size)

    def const_spec(arr):
        return pl.BlockSpec(arr.shape, lambda i: (0, 0))

    out = pl.pallas_call(
        kernel,
        out_shape=jax.ShapeDtypeStruct((B_pad, out_cols), jnp.float32),
        grid=(B_pad // tile_b,),
        in_specs=[
            pl.BlockSpec((tile_b, k_pad), lambda i: (i, 0)),      # x: batch-tiled
            const_spec(packed["w1"]), const_spec(packed["b1"]),   # VMEM-resident
            const_spec(packed["w2"]), const_spec(packed["b2"]),
            const_spec(packed["wh"]), const_spec(packed["bh"]),
        ],
        out_specs=pl.BlockSpec((tile_b, out_cols), lambda i: (i, 0)),
        compiler_params=pltpu.CompilerParams(
            dimension_semantics=("parallel",)),
    )(x, packed["w1"], packed["b1"], packed["w2"], packed["b2"],
      packed["wh"], packed["bh"])

    # unpad: [B_pad, A*128] -> [B, A, atom_size]
    out = out.reshape(B_pad, action_dim, _LANE)[:B, :, :atom_size]
    return out


def init_params(key, state_dim, action_dim, atom_size, std_init=0.5):
    """Deterministic parameter init mimicking the PyTorch module's __init__."""
    ks = jax.random.split(key, 12)
    hidden = _HIDDEN

    def linear_init(kw, kb, fan_in, fan_out):
        # PyTorch nn.Linear default: U(-1/sqrt(fan_in), 1/sqrt(fan_in))
        bound = 1.0 / (fan_in ** 0.5)
        w = jax.random.uniform(kw, (fan_in, fan_out), jnp.float32, -bound, bound)
        b = jax.random.uniform(kb, (1, fan_out), jnp.float32, -bound, bound)
        return w, b

    def noisy_init(kmu_w, kmu_b, keps_w, keps_b, fan_in, fan_out):
        mu_range = 1.0 / (fan_in ** 0.5)
        sigma_val = std_init / (fan_in ** 0.5)
        w_mu = jax.random.uniform(kmu_w, (fan_in, fan_out), jnp.float32,
                                  -mu_range, mu_range)
        b_mu = jax.random.uniform(kmu_b, (1, fan_out), jnp.float32,
                                  -mu_range, mu_range)
        w_eps = jax.random.normal(keps_w, (fan_in, fan_out), jnp.float32)
        b_eps = jax.random.normal(keps_b, (1, fan_out), jnp.float32)
        # Training mode: effective weight = mu + sigma * epsilon (epsilon
        # frozen at init; resample outside if noise refresh is needed).
        w = w_mu + sigma_val * w_eps
        b = b_mu + sigma_val * b_eps
        return w, b

    w1, b1 = linear_init(ks[0], ks[1], state_dim, hidden)
    w2, b2 = linear_init(ks[2], ks[3], hidden, hidden)
    wa, ba = noisy_init(ks[4], ks[5], ks[6], ks[7], hidden, action_dim * atom_size)
    wv, bv = noisy_init(ks[8], ks[9], ks[10], ks[11], hidden, atom_size)
    return {"w1": w1, "b1": b1, "w2": w2, "b2": b2,
            "wa": wa, "ba": ba, "wv": wv, "bv": bv}


def reference_forward(x, params, *, action_dim, atom_size):
    """Pure-JAX f32 reference mirroring the PyTorch forward."""
    h = jax.nn.relu(x @ params["w1"] + params["b1"])
    h = jax.nn.relu(h @ params["w2"] + params["b2"])
    adv = (h @ params["wa"] + params["ba"]).reshape(-1, action_dim, atom_size)
    val = (h @ params["wv"] + params["bv"]).reshape(-1, 1, atom_size)
    q = val + adv - adv.mean(axis=1, keepdims=True)
    return jax.nn.softmax(q, axis=-1)


if __name__ == "__main__":
    B, state_dim, action_dim, atom_size = 2, 32, 4, 51

    key = jax.random.PRNGKey(0)
    kx, kp = jax.random.split(key)
    x = jax.random.normal(kx, (B, state_dim), jnp.float32)
    params = init_params(kp, state_dim, action_dim, atom_size)
    packed = pack_head_params(params, action_dim=action_dim,
                              atom_size=atom_size)

    q_dist = rainbow_dqn_forward(x, packed,
                                 action_dim=action_dim, atom_size=atom_size)
    q_dist = jax.block_until_ready(q_dist)

    q_ref = reference_forward(x, params,
                              action_dim=action_dim, atom_size=atom_size)
    assert q_dist.shape == (B, action_dim, atom_size)
    # bf16 matmul operands (f32 accumulate) -> small logit perturbation; the
    # resulting softmax probabilities match the f32 reference to well under 5e-3.
    assert jnp.allclose(q_dist, q_ref, atol=5e-3, rtol=1e-2)
    # exact divide in the kernel: distributions sum to 1 to fp32 precision
    assert jnp.allclose(q_dist.sum(axis=-1), 1.0, atol=1e-4)

    print("KERNEL_OK")
</pallas_src>

<mosaic_0001>
module attributes {stable_mosaic.version = 11 : i64} {
  func.func @_rainbow_kernel(%arg0: i32, %arg1: memref<8x128xbf16, #tpu.memory_space<vmem>>, %arg2: memref<128x128xbf16, #tpu.memory_space<vmem>>, %arg3: memref<1x128xf32, #tpu.memory_space<vmem>>, %arg4: memref<128x128xbf16, #tpu.memory_space<vmem>>, %arg5: memref<1x128xf32, #tpu.memory_space<vmem>>, %arg6: memref<128x640xbf16, #tpu.memory_space<vmem>>, %arg7: memref<1x640xf32, #tpu.memory_space<vmem>>, %arg8: memref<8x512xf32, #tpu.memory_space<vmem>>) attributes {dimension_semantics = [#tpu.dimension_semantics<parallel>], iteration_bounds = array<i64: 1>, scalar_prefetch = 0 : i64, scratch_operands = 0 : i64, tpu.core_type = #tpu.core_type<tc>, window_params = [{transform_indices = @transform_0, window_bounds = array<i64: 8, 128>}, {pipeline_mode = #tpu.pipeline_mode<synchronous>, transform_indices = @transform_1, window_bounds = array<i64: 128, 128>}, {pipeline_mode = #tpu.pipeline_mode<synchronous>, transform_indices = @transform_2, window_bounds = array<i64: 1, 128>}, {pipeline_mode = #tpu.pipeline_mode<synchronous>, transform_indices = @transform_3, window_bounds = array<i64: 128, 128>}, {pipeline_mode = #tpu.pipeline_mode<synchronous>, transform_indices = @transform_4, window_bounds = array<i64: 1, 128>}, {pipeline_mode = #tpu.pipeline_mode<synchronous>, transform_indices = @transform_5, window_bounds = array<i64: 128, 640>}, {pipeline_mode = #tpu.pipeline_mode<synchronous>, transform_indices = @transform_6, window_bounds = array<i64: 1, 640>}, {transform_indices = @transform_7, window_bounds = array<i64: 8, 512>}]} {
    %c0 = arith.constant 0 : index
    %c0_0 = arith.constant 0 : index
    %0 = vector.load %arg1[%c0, %c0_0] : memref<8x128xbf16, #tpu.memory_space<vmem>>, vector<8x128xbf16>
    %c0_1 = arith.constant 0 : index
    %c0_2 = arith.constant 0 : index
    %1 = vector.load %arg2[%c0_1, %c0_2] : memref<128x128xbf16, #tpu.memory_space<vmem>>, vector<128x128xbf16>
    %cst = arith.constant dense<0.000000e+00> : vector<8x128xf32>
    %2 = tpu.matmul %0, %1, %cst {dimension_numbers = #tpu.dot_dimension_numbers<[1], [0], [0], [1], [0, 0, 1, 1], [], []>} : vector<8x128xbf16>, vector<128x128xbf16>, vector<8x128xf32> -> vector<8x128xf32>
    %c0_3 = arith.constant 0 : index
    %c0_4 = arith.constant 0 : index
    %3 = vector.load %arg3[%c0_3, %c0_4] : memref<1x128xf32, #tpu.memory_space<vmem>>, vector<1x128xf32>
    %4 = vector.broadcast %3 : vector<1x128xf32> to vector<8x128xf32>
    %5 = arith.addf %2, %4 : vector<8x128xf32>
    %cst_5 = arith.constant 0.000000e+00 : f32
    %6 = vector.broadcast %cst_5 : f32 to vector<8x128xf32>
    %7 = arith.maximumf %5, %6 : vector<8x128xf32>
    %8 = arith.truncf %7 : vector<8x128xf32> to vector<8x128xbf16>
    %c0_6 = arith.constant 0 : index
    %c0_7 = arith.constant 0 : index
    %9 = vector.load %arg4[%c0_6, %c0_7] : memref<128x128xbf16, #tpu.memory_space<vmem>>, vector<128x128xbf16>
    %cst_8 = arith.constant dense<0.000000e+00> : vector<8x128xf32>
    %10 = tpu.matmul %8, %9, %cst_8 {dimension_numbers = #tpu.dot_dimension_numbers<[1], [0], [0], [1], [0, 0, 1, 1], [], []>} : vector<8x128xbf16>, vector<128x128xbf16>, vector<8x128xf32> -> vector<8x128xf32>
    %c0_9 = arith.constant 0 : index
    %c0_10 = arith.constant 0 : index
    %11 = vector.load %arg5[%c0_9, %c0_10] : memref<1x128xf32, #tpu.memory_space<vmem>>, vector<1x128xf32>
    %12 = vector.broadcast %11 : vector<1x128xf32> to vector<8x128xf32>
    %13 = arith.addf %10, %12 : vector<8x128xf32>
    %cst_11 = arith.constant 0.000000e+00 : f32
    %14 = vector.broadcast %cst_11 : f32 to vector<8x128xf32>
    %15 = arith.maximumf %13, %14 : vector<8x128xf32>
    %16 = arith.truncf %15 : vector<8x128xf32> to vector<8x128xbf16>
    %c0_12 = arith.constant 0 : index
    %c0_13 = arith.constant 0 : index
    %17 = vector.load %arg6[%c0_12, %c0_13] : memref<128x640xbf16, #tpu.memory_space<vmem>>, vector<128x640xbf16>
    %cst_14 = arith.constant dense<0.000000e+00> : vector<8x640xf32>
    %18 = tpu.matmul %16, %17, %cst_14 {dimension_numbers = #tpu.dot_dimension_numbers<[1], [0], [0], [1], [0, 0, 1, 1], [], []>} : vector<8x128xbf16>, vector<128x640xbf16>, vector<8x640xf32> -> vector<8x640xf32>
    %c0_15 = arith.constant 0 : index
    %c0_16 = arith.constant 0 : index
    %19 = vector.load %arg7[%c0_15, %c0_16] : memref<1x640xf32, #tpu.memory_space<vmem>>, vector<1x640xf32>
    %20 = vector.broadcast %19 : vector<1x640xf32> to vector<8x640xf32>
    %21 = arith.addf %18, %20 : vector<8x640xf32>
    %22 = vector.extract_strided_slice %21 {offsets = [0, 512], sizes = [8, 128], strides = [1, 1]} : vector<8x640xf32> to vector<8x128xf32>
    %23 = vector.extract_strided_slice %21 {offsets = [0, 0], sizes = [8, 128], strides = [1, 1]} : vector<8x640xf32> to vector<8x128xf32>
    %24 = vector.extract_strided_slice %21 {offsets = [0, 128], sizes = [8, 128], strides = [1, 1]} : vector<8x640xf32> to vector<8x128xf32>
    %25 = vector.extract_strided_slice %21 {offsets = [0, 256], sizes = [8, 128], strides = [1, 1]} : vector<8x640xf32> to vector<8x128xf32>
    %26 = vector.extract_strided_slice %21 {offsets = [0, 384], sizes = [8, 128], strides = [1, 1]} : vector<8x640xf32> to vector<8x128xf32>
    %27 = arith.addf %23, %24 : vector<8x128xf32>
    %28 = arith.addf %27, %25 : vector<8x128xf32>
    %29 = arith.addf %28, %26 : vector<8x128xf32>
    %cst_17 = arith.constant 2.500000e-01 : f32
    %30 = vector.broadcast %cst_17 : f32 to vector<8x128xf32>
    %31 = arith.mulf %29, %30 : vector<8x128xf32>
    %32 = arith.subf %22, %31 : vector<8x128xf32>
    %33 = tpu.iota {dimensions = array<i32: 1>} : vector<8x128xi32>
    %c51_i32 = arith.constant 51 : i32
    %34 = vector.broadcast %c51_i32 : i32 to vector<8x128xi32>
    %35 = arith.cmpi slt, %33, %34 : vector<8x128xi32>
    %36 = arith.addf %32, %23 : vector<8x128xf32>
    %cst_18 = arith.constant -1.000000e+30 : f32
    %37 = vector.broadcast %cst_18 : f32 to vector<8x128xf32>
    %38 = arith.select %35, %36, %37 : vector<8x128xi1>, vector<8x128xf32>
    %cst_19 = arith.constant dense<0xFF800000> : vector<8xf32>
    %39 = vector.multi_reduction <maximumf>, %38, %cst_19 [1] : vector<8x128xf32> to vector<8xf32>
    %40 = vector.shape_cast %39 : vector<8xf32> to vector<8x1xf32>
    %41 = vector.broadcast %40 : vector<8x1xf32> to vector<8x128xf32>
    %42 = arith.subf %36, %41 : vector<8x128xf32>
    %43 = math.exp %42 : vector<8x128xf32>
    %cst_20 = arith.constant 0.000000e+00 : f32
    %44 = vector.broadcast %cst_20 : f32 to vector<8x128xf32>
    %45 = arith.select %35, %43, %44 : vector<8x128xi1>, vector<8x128xf32>
    %cst_21 = arith.constant dense<0.000000e+00> : vector<8xf32>
    %46 = vector.multi_reduction <add>, %45, %cst_21 [1] : vector<8x128xf32> to vector<8xf32>
    %47 = vector.shape_cast %46 : vector<8xf32> to vector<8x1xf32>
    %48 = vector.broadcast %47 : vector<8x1xf32> to vector<8x128xf32>
    %49 = arith.divf %45, %48 : vector<8x128xf32>
    %c0_22 = arith.constant 0 : index
    %c0_23 = arith.constant 0 : index
    %50 = vector.load %arg8[%c0_22, %c0_23] : memref<8x512xf32, #tpu.memory_space<vmem>>, vector<8x128xf32>
    tpu.vector_store %arg8[%c0_22, %c0_23], %49 {strides = array<i32>} : memref<8x512xf32, #tpu.memory_space<vmem>>, vector<8x128xf32>,
    %51 = arith.addf %32, %24 : vector<8x128xf32>
    %cst_24 = arith.constant -1.000000e+30 : f32
    %52 = vector.broadcast %cst_24 : f32 to vector<8x128xf32>
    %53 = arith.select %35, %51, %52 : vector<8x128xi1>, vector<8x128xf32>
    %cst_25 = arith.constant dense<0xFF800000> : vector<8xf32>
    %54 = vector.multi_reduction <maximumf>, %53, %cst_25 [1] : vector<8x128xf32> to vector<8xf32>
    %55 = vector.shape_cast %54 : vector<8xf32> to vector<8x1xf32>
    %56 = vector.broadcast %55 : vector<8x1xf32> to vector<8x128xf32>
    %57 = arith.subf %51, %56 : vector<8x128xf32>
    %58 = math.exp %57 : vector<8x128xf32>
    %cst_26 = arith.constant 0.000000e+00 : f32
    %59 = vector.broadcast %cst_26 : f32 to vector<8x128xf32>
    %60 = arith.select %35, %58, %59 : vector<8x128xi1>, vector<8x128xf32>
    %cst_27 = arith.constant dense<0.000000e+00> : vector<8xf32>
    %61 = vector.multi_reduction <add>, %60, %cst_27 [1] : vector<8x128xf32> to vector<8xf32>
    %62 = vector.shape_cast %61 : vector<8xf32> to vector<8x1xf32>
    %63 = vector.broadcast %62 : vector<8x1xf32> to vector<8x128xf32>
    %64 = arith.divf %60, %63 : vector<8x128xf32>
    %c0_28 = arith.constant 0 : index
    %c128 = arith.constant 128 : index
    %65 = vector.load %arg8[%c0_28, %c128] : memref<8x512xf32, #tpu.memory_space<vmem>>, vector<8x128xf32>
    tpu.vector_store %arg8[%c0_28, %c128], %64 {strides = array<i32>} : memref<8x512xf32, #tpu.memory_space<vmem>>, vector<8x128xf32>,
    %66 = arith.addf %32, %25 : vector<8x128xf32>
    %cst_29 = arith.constant -1.000000e+30 : f32
    %67 = vector.broadcast %cst_29 : f32 to vector<8x128xf32>
    %68 = arith.select %35, %66, %67 : vector<8x128xi1>, vector<8x128xf32>
    %cst_30 = arith.constant dense<0xFF800000> : vector<8xf32>
    %69 = vector.multi_reduction <maximumf>, %68, %cst_30 [1] : vector<8x128xf32> to vector<8xf32>
    %70 = vector.shape_cast %69 : vector<8xf32> to vector<8x1xf32>
    %71 = vector.broadcast %70 : vector<8x1xf32> to vector<8x128xf32>
    %72 = arith.subf %66, %71 : vector<8x128xf32>
    %73 = math.exp %72 : vector<8x128xf32>
    %cst_31 = arith.constant 0.000000e+00 : f32
    %74 = vector.broadcast %cst_31 : f32 to vector<8x128xf32>
    %75 = arith.select %35, %73, %74 : vector<8x128xi1>, vector<8x128xf32>
    %cst_32 = arith.constant dense<0.000000e+00> : vector<8xf32>
    %76 = vector.multi_reduction <add>, %75, %cst_32 [1] : vector<8x128xf32> to vector<8xf32>
    %77 = vector.shape_cast %76 : vector<8xf32> to vector<8x1xf32>
    %78 = vector.broadcast %77 : vector<8x1xf32> to vector<8x128xf32>
    %79 = arith.divf %75, %78 : vector<8x128xf32>
    %c0_33 = arith.constant 0 : index
    %c256 = arith.constant 256 : index
    %80 = vector.load %arg8[%c0_33, %c256] : memref<8x512xf32, #tpu.memory_space<vmem>>, vector<8x128xf32>
    tpu.vector_store %arg8[%c0_33, %c256], %79 {strides = array<i32>} : memref<8x512xf32, #tpu.memory_space<vmem>>, vector<8x128xf32>,
    %81 = arith.addf %32, %26 : vector<8x128xf32>
    %cst_34 = arith.constant -1.000000e+30 : f32
    %82 = vector.broadcast %cst_34 : f32 to vector<8x128xf32>
    %83 = arith.select %35, %81, %82 : vector<8x128xi1>, vector<8x128xf32>
    %cst_35 = arith.constant dense<0xFF800000> : vector<8xf32>
    %84 = vector.multi_reduction <maximumf>, %83, %cst_35 [1] : vector<8x128xf32> to vector<8xf32>
    %85 = vector.shape_cast %84 : vector<8xf32> to vector<8x1xf32>
    %86 = vector.broadcast %85 : vector<8x1xf32> to vector<8x128xf32>
    %87 = arith.subf %81, %86 : vector<8x128xf32>
    %88 = math.exp %87 : vector<8x128xf32>
    %cst_36 = arith.constant 0.000000e+00 : f32
    %89 = vector.broadcast %cst_36 : f32 to vector<8x128xf32>
    %90 = arith.select %35, %88, %89 : vector<8x128xi1>, vector<8x128xf32>
    %cst_37 = arith.constant dense<0.000000e+00> : vector<8xf32>
    %91 = vector.multi_reduction <add>, %90, %cst_37 [1] : vector<8x128xf32> to vector<8xf32>
    %92 = vector.shape_cast %91 : vector<8xf32> to vector<8x1xf32>
    %93 = vector.broadcast %92 : vector<8x1xf32> to vector<8x128xf32>
    %94 = arith.divf %90, %93 : vector<8x128xf32>
    %c0_38 = arith.constant 0 : index
    %c384 = arith.constant 384 : index
    %95 = vector.load %arg8[%c0_38, %c384] : memref<8x512xf32, #tpu.memory_space<vmem>>, vector<8x128xf32>
    tpu.vector_store %arg8[%c0_38, %c384], %94 {strides = array<i32>} : memref<8x512xf32, #tpu.memory_space<vmem>>, vector<8x128xf32>,
    return
  }
  func.func @transform_0(%arg0: i32) -> (i32, i32) {
    %c0_i32 = arith.constant 0 : i32
    %c0_i32_0 = arith.constant 0 : i32
    return %arg0, %c0_i32 : i32, i32
  }
  func.func @transform_1(%arg0: i32) -> (i32, i32) {
    %c0_i32 = arith.constant 0 : i32
    %c0_i32_0 = arith.constant 0 : i32
    %c0_i32_1 = arith.constant 0 : i32
    return %c0_i32, %c0_i32_0 : i32, i32
  }
  func.func @transform_2(%arg0: i32) -> (i32, i32) {
    %c0_i32 = arith.constant 0 : i32
    %c0_i32_0 = arith.constant 0 : i32
    %c0_i32_1 = arith.constant 0 : i32
    return %c0_i32, %c0_i32_0 : i32, i32
  }
  func.func @transform_3(%arg0: i32) -> (i32, i32) {
    %c0_i32 = arith.constant 0 : i32
    %c0_i32_0 = arith.constant 0 : i32
    %c0_i32_1 = arith.constant 0 : i32
    return %c0_i32, %c0_i32_0 : i32, i32
  }
  func.func @transform_4(%arg0: i32) -> (i32, i32) {
    %c0_i32 = arith.constant 0 : i32
    %c0_i32_0 = arith.constant 0 : i32
    %c0_i32_1 = arith.constant 0 : i32
    return %c0_i32, %c0_i32_0 : i32, i32
  }
  func.func @transform_5(%arg0: i32) -> (i32, i32) {
    %c0_i32 = arith.constant 0 : i32
    %c0_i32_0 = arith.constant 0 : i32
    %c0_i32_1 = arith.constant 0 : i32
    return %c0_i32, %c0_i32_0 : i32, i32
  }
  func.func @transform_6(%arg0: i32) -> (i32, i32) {
    %c0_i32 = arith.constant 0 : i32
    %c0_i32_0 = arith.constant 0 : i32
    %c0_i32_1 = arith.constant 0 : i32
    return %c0_i32, %c0_i32_0 : i32, i32
  }
  func.func @transform_7(%arg0: i32) -> (i32, i32) {
    %c0_i32 = arith.constant 0 : i32
    %c0_i32_0 = arith.constant 0 : i32
    return %arg0, %c0_i32 : i32, i32
  }
}

</mosaic_0001>

<bundles_post_ra>
// kernel: tpu_custom_call.1
= control target key start
LH: loop header
LB: loop body
LE: loop exit
PB: predicated region body
PF: predicated region fallthrough
CT: control target
= control target key end

     0   :  { %12 = vsyncpa [#allocation3], 0  ;;  %s1318_s0 = inlined_call_operand.hbm [shape: bf16[8,128], index: 0, kind: input, shape index: {}]   ;;  %s1319_s1 = inlined_call_operand.hbm [shape: bf16[128,128], index: 1, kind: input, shape index: {}]   ;;  %s1320_s2 = inlined_call_operand.vmem [shape: f32[1,128], index: 2, kind: input, shape index: {}]   ;;  %s1321_s3 = inlined_call_operand.hbm [shape: bf16[128,128], index: 3, kind: input, shape index: {}]   ;;  %s1322_s4 = inlined_call_operand.vmem [shape: f32[1,128], index: 4, kind: input, shape index: {}]   ;;  %s1323_s5 = inlined_call_operand.hbm [shape: bf16[128,640], index: 5, kind: input, shape index: {}]   ;;  %s1324_s6 = inlined_call_operand.vmem [shape: f32[1,640], index: 6, kind: input, shape index: {}]   ;;  %s1325_s7 = inlined_call_operand.hbm [shape: f32[8,512], index: 7, kind: output, shape index: {}]  }
   0x1   :  { %13 = vsyncpa [#allocation6], 0 }
   0x2   :  { %14 = vsyncpa [#allocation9], 0 }
   0x3   :  { %15 = vsyncpa [#allocation4], 0  ;;  %s1153_s24 = smov [#allocation5]   ;;  %s1035_s28 = scalar_lea.hbm %s1319_s1, 1024 }
   0x4   :  { %s31_s25 = sshll.u32 %s1153_s24, 4  ;;  %p1036_p0 = scmp.ne.s32.totalorder %s1319_s1, %s1035_s28  ;;  %s32_s25 = int_to_ptr.vmem [resolvable:$true] %s31_s25 }
   0x5   :  { %p1039_p1 = scmp.lt.u32.totalorder %s1035_s28, %s1319_s1 }
   0x7   :  { %p1041_p2 = pnand %p1039_p1, %p1036_p0 }
   0x9   :  { %1044 = shalt.err (!%p1041_p2)
}
   0xa   :  { %s1045_s10 = scalar_lea.vmem %s32_s25, 1024  ;;  %p1050_p4 = scmp.lt.s32.totalorder %s32_s25, %s32_s25 }
   0xb   :  { %p1046_p3 = scmp.ne.s32.totalorder %s32_s25, %s1045_s10  ;;  %p1051_p5 = scmp.lt.s32.totalorder %s1045_s10, %s1045_s10 }
   0xd   :  { %p1052_p6 = por %p1051_p5, %p1050_p4 }
   0xf   :  { %p1053_p7 = pnand %p1052_p6, %p1046_p3 }
  0x11   :  { %1056 = shalt.err (!%p1053_p7)
}
  0x12   :  { %s1154_s11 = smov 64   ;;  %s1155_s12 = smov 4  }
  0x13   :  { %37 = dma.hbm_to_vmem [thread:$0]  %s1319_s1, 1024, %s32_s25, [#allocation6], %s1154_s11, %s1154_s11, %s1155_s12  }
  0x14   :  { %s1156_s15 = smov [#allocation2]   ;;  %s1157_s17 = smov [#allocation7]  }
  0x15   :  { %s22_s16 = sshll.u32 %s1156_s15, 4  ;;  %s45_s18 = sshll.u32 %s1157_s17, 4  ;;  %s23_s16 = int_to_ptr.vmem [resolvable:$true] %s22_s16  ;;  %s46_s18 = int_to_ptr.vmem [resolvable:$true] %s45_s18 }
  0x16   :  { %s1057_s21 = scalar_lea.hbm %s1318_s0, 64 }
  0x17   :  { %p1058_p8 = scmp.ne.s32.totalorder %s1318_s0, %s1057_s21  ;;  %p1061_p9 = scmp.lt.u32.totalorder %s1057_s21, %s1318_s0 }
  0x19   :  { %p1063_p10 = pnand %p1061_p9, %p1058_p8 }
  0x1b   :  { %1066 = shalt.err (!%p1063_p10)
}
  0x1c   :  { %s1067_s1 = scalar_lea.vmem %s23_s16, 64  ;;  %p1072_p12 = scmp.lt.s32.totalorder %s23_s16, %s23_s16 }
  0x1d   :  { %p1068_p11 = scmp.ne.s32.totalorder %s23_s16, %s1067_s1  ;;  %p1073_p13 = scmp.lt.s32.totalorder %s1067_s1, %s1067_s1 }
  0x1f   :  { %p1074_p0 = por %p1073_p13, %p1072_p12 }
  0x21   :  { %p1075_p1 = pnand %p1074_p0, %p1068_p11 }
  0x23   :  { %1078 = shalt.err (!%p1075_p1)
}
  0x24   :  { %25 = dma.hbm_to_vmem [thread:$0]  %s1318_s0, 64, %s23_s16, [#allocation3]  }
  0x25   :  { %s1079_s30 = scalar_lea.hbm %s1321_s3, 1024 }
  0x26   :  { %p1080_p2 = scmp.ne.s32.totalorder %s1321_s3, %s1079_s30  ;;  %p1083_p3 = scmp.lt.u32.totalorder %s1079_s30, %s1321_s3 }
  0x28   :  { %p1085_p4 = pnand %p1083_p3, %p1080_p2 }
  0x2a   :  { %1088 = shalt.err (!%p1085_p4)
}
  0x2b   :  { %s1089_s14 = scalar_lea.vmem %s46_s18, 1024  ;;  %p1094_p6 = scmp.lt.s32.totalorder %s46_s18, %s46_s18 }
  0x2c   :  { %p1090_p5 = scmp.ne.s32.totalorder %s46_s18, %s1089_s14  ;;  %p1095_p7 = scmp.lt.s32.totalorder %s1089_s14, %s1089_s14 }
  0x2e   :  { %p1096_p8 = por %p1095_p7, %p1094_p6 }
  0x30   :  { %p1097_p9 = pnand %p1096_p8, %p1090_p5 }
  0x32   :  { %1100 = shalt.err (!%p1097_p9)
}
  0x33   :  { %51 = dma.hbm_to_vmem [thread:$0]  %s1321_s3, 1024, %s46_s18, [#allocation6], %s1154_s11, %s1154_s11, %s1155_s12  }
  0x34   :  { %s1158_s16 = smov [#allocation8]   ;;  %s1101_s21 = scalar_lea.hbm %s1323_s5, 5120 }
  0x35   :  { %s59_s17 = sshll.u32 %s1158_s16, 4  ;;  %p1102_p10 = scmp.ne.s32.totalorder %s1323_s5, %s1101_s21  ;;  %s60_s17 = int_to_ptr.vmem [resolvable:$true] %s59_s17 }
  0x36   :  { %p1105_p11 = scmp.lt.u32.totalorder %s1101_s21, %s1323_s5 }
  0x38   :  { %p1107_p12 = pnand %p1105_p11, %p1102_p10 }
  0x3a   :  { %1110 = shalt.err (!%p1107_p12)
}
  0x3b   :  { %s1111_s1 = scalar_lea.vmem %s60_s17, 5120  ;;  %p1116_p0 = scmp.lt.s32.totalorder %s60_s17, %s60_s17 }
  0x3c   :  { %p1112_p13 = scmp.ne.s32.totalorder %s60_s17, %s1111_s1  ;;  %p1117_p1 = scmp.lt.s32.totalorder %s1111_s1, %s1111_s1 }
  0x3e   :  { %p1118_p2 = por %p1117_p1, %p1116_p0 }
  0x40   :  { %p1119_p3 = pnand %p1118_p2, %p1112_p13 }
  0x42   :  { %1122 = shalt.err (!%p1119_p3)
}
  0x43   :  { %s1159_s3 = smov 320   ;;  %s1160_s11 = smov 20  }
  0x44   :  { %65 = dma.hbm_to_vmem [thread:$0]  %s1323_s5, 5120, %s60_s17, [#allocation9], %s1159_s3, %s1159_s3, %s1160_s11  }
  0x45   :  { %1145 = dma.done.wait [#allocation3], 64  }
  0x46   :  { %1146 = vsyncadd [#allocation3], 4294967232 }
  0x47   :  { %1147 = dma.done.wait [#allocation6], 2048  }
  0x48   :  { %1148 = vsyncadd [#allocation6], 4294965248 }
  0x49   :  { %1149 = dma.done.wait [#allocation9], 5120  }
  0x4a   :  { %1150 = vsyncadd [#allocation9], 4294962176  ;;  %v1161_v0 = vmov 0.0   ;;  %vm1162_vm0 = vmmov 0   ;;  %v947_v1 = vld [vmem:[#allocation5] sm:$0xff]   ;;  %v948_v2 = vld [vmem:[#allocation5 + $0x8] sm:$0xff]  }
  0x4b   :  { %875 = vmatprep.subr.bf16.mxu0 %v1161_v0  ;;  %891 = vmatprep.mubr.msk.bf16.mxu0 %vm1162_vm0, %v1161_v0  ;;  %v949_v3 = vld [vmem:[#allocation5 + $0x10] sm:$0xff]   ;;  %v955_v4 = vld [vmem:[#allocation7] sm:$0xff]   ;;  %v950_v5 = vld [vmem:[#allocation5 + $0x18] sm:$0xff]   ;;  %v1163_v58 = vmov 0  }
  0x4c   :  { %895 = vmatprep.subr.bf16.mxu1 %v1161_v0  ;;  %911 = vmatprep.mubr.msk.bf16.mxu1 %vm1162_vm0, %v1161_v0  ;;  %v956_v6 = vld [vmem:[#allocation7 + $0x8] sm:$0xff]   ;;  %v951_v7 = vld [vmem:[#allocation5 + $0x20] sm:$0xff]   ;;  %v957_v8 = vld [vmem:[#allocation7 + $0x10] sm:$0xff]  }
  0x4d   :  { %876 = vmatpush3.bf16.msra.mxu0 %v947_v1  ;;  %896 = vmatpush3.bf16.msra.mxu1 %v955_v4  ;;  %v952_v9 = vld [vmem:[#allocation5 + $0x28] sm:$0xff]   ;;  %v958_v10 = vld [vmem:[#allocation7 + $0x18] sm:$0xff]   ;;  %v953_v11 = vld [vmem:[#allocation5 + $0x30] sm:$0xff]  }
  0x4e   :  { %877 = vmatprep.subr.bf16.mxu0 %v1161_v0  ;;  %897 = vmatprep.subr.bf16.mxu1 %v1161_v0  ;;  %v959_v12 = vld [vmem:[#allocation7 + $0x20] sm:$0xff]   ;;  %v954_v13 = vld [vmem:[#allocation5 + $0x38] sm:$0xff]   ;;  %v960_v14 = vld [vmem:[#allocation7 + $0x28] sm:$0xff]  }
  0x4f   :  { %v81_v15 = vld [vmem:[#allocation2] sm:$0xf]  ;;  %v961_v16 = vld [vmem:[#allocation7 + $0x30] sm:$0xff]   ;;  %v965_v19 = vld [vmem:[#allocation8 + $0x4] ss:$20 sps:$4 sm:$0xff]  }
  0x50   :  { %v962_v17 = vld [vmem:[#allocation7 + $0x38] sm:$0xff]   ;;  %v963_v18 = vld [vmem:[#allocation8] ss:$20 sps:$4 sm:$0xff]   ;;  %v975_v24 = vld [vmem:[#allocation8 + $0x50] ss:$20 sps:$4 sm:$0xff]  }
  0x51   :  { %878 = vmatpush3.bf16.msra.mxu0 %v948_v2  ;;  %898 = vmatpush3.bf16.msra.mxu1 %v956_v6  ;;  %v968_v20 = vld [vmem:[#allocation8 + $0xc] ss:$20 sps:$4 sm:$0xff]   ;;  %v969_v22 = vld [vmem:[#allocation8 + $0x28] ss:$20 sps:$4 sm:$0xff]   ;;  %v989_v27 = vld [vmem:[#allocation8 + $0xa4] ss:$20 sps:$4 sm:$0xff]  }
  0x52   :  { %879 = vmatprep.subr.bf16.mxu0 %v1161_v0  ;;  %899 = vmatprep.subr.bf16.mxu1 %v1161_v0  ;;  %v971_v21 = vld [vmem:[#allocation8 + $0x2c] ss:$20 sps:$4 sm:$0xff]   ;;  %v977_v23 = vld [vmem:[#allocation8 + $0x54] ss:$20 sps:$4 sm:$0xff]   ;;  %v983_v25 = vld [vmem:[#allocation8 + $0x7c] ss:$20 sps:$4 sm:$0xff]  }
  0x53   :  { %v981_v26 = vld [vmem:[#allocation8 + $0x78] ss:$20 sps:$4 sm:$0xff]   ;;  %v987_v28 = vld [vmem:[#allocation8 + $0xa0] ss:$20 sps:$4 sm:$0xff]   ;;  %v993_v30 = vld [vmem:[#allocation8 + $0xc8] ss:$20 sps:$4 sm:$0xff]  }
  0x54   :  { %v995_v29 = vld [vmem:[#allocation8 + $0xcc] ss:$20 sps:$4 sm:$0xff]   ;;  %v1001_v31 = vld [vmem:[#allocation8 + $0xf4] ss:$20 sps:$4 sm:$0xff]   ;;  %v999_v32 = vld [vmem:[#allocation8 + $0xf0] ss:$20 sps:$4 sm:$0xff]  }
  0x55   :  { %880 = vmatpush3.bf16.msra.mxu0 %v949_v3  ;;  %900 = vmatpush3.bf16.msra.mxu1 %v957_v8  ;;  %v790_v33 = vld [vmem:[%s1320_s2] ss:$0 sm:$0xff]  ;;  %v966_v40 = vld [vmem:[#allocation8 + $0x8] ss:$20 sps:$4 sm:$0xff]   ;;  %v972_v43 = vld [vmem:[#allocation8 + $0x30] ss:$20 sps:$4 sm:$0xff]  }
  0x56   :  { %881 = vmatprep.subr.bf16.mxu0 %v1161_v0  ;;  %901 = vmatprep.subr.bf16.mxu1 %v1161_v0  ;;  %v974_v42 = vld [vmem:[#allocation8 + $0x34] ss:$20 sps:$4 sm:$0xff]   ;;  %v980_v44 = vld [vmem:[#allocation8 + $0x5c] ss:$20 sps:$4 sm:$0xff]   ;;  %v978_v45 = vld [vmem:[#allocation8 + $0x58] ss:$20 sps:$4 sm:$0xff]  }
  0x57   :  { %v986_v46 = vld [vmem:[#allocation8 + $0x84] ss:$20 sps:$4 sm:$0xff]   ;;  %v984_v47 = vld [vmem:[#allocation8 + $0x80] ss:$20 sps:$4 sm:$0xff]   ;;  %v990_v49 = vld [vmem:[#allocation8 + $0xa8] ss:$20 sps:$4 sm:$0xff]  }
  0x58   :  { %v992_v48 = vld [vmem:[#allocation8 + $0xac] ss:$20 sps:$4 sm:$0xff]   ;;  %v998_v50 = vld [vmem:[#allocation8 + $0xd4] ss:$20 sps:$4 sm:$0xff]   ;;  %v996_v51 = vld [vmem:[#allocation8 + $0xd0] ss:$20 sps:$4 sm:$0xff]  }
  0x59   :  { %882 = vmatpush3.bf16.msra.mxu0 %v950_v5  ;;  %902 = vmatpush3.bf16.msra.mxu1 %v958_v10  ;;  %v1004_v52 = vld [vmem:[#allocation8 + $0xfc] ss:$20 sps:$4 sm:$0xff]   ;;  %v1002_v53 = vld [vmem:[#allocation8 + $0xf8] ss:$20 sps:$4 sm:$0xff]   ;;  %v1008_v57 = vld [vmem:[#allocation8 + $0x120] ss:$20 sps:$4 sm:$0xff]  }
  0x5a   :  { %883 = vmatprep.subr.bf16.mxu0 %v1161_v0  ;;  %903 = vmatprep.subr.bf16.mxu1 %v1161_v0  ;;  %v1007_v54 = vld [vmem:[#allocation8 + $0x11c] ss:$20 sps:$4 sm:$0xff]   ;;  %v1005_v55 = vld [vmem:[#allocation8 + $0x118] ss:$20 sps:$4 sm:$0xff]   ;;  %v799_v59 = vld [vmem:[%s1322_s4] ss:$0 sm:$0xff] }
  0x5b   :  { %v1010_v56 = vld [vmem:[#allocation8 + $0x124] ss:$20 sps:$4 sm:$0xff]   ;;  %v1013_v6 = vld [vmem:[#allocation8 + $0x60] ss:$20 sps:$4 sm:$0xff]  }
  0x5c   :  { %v1011_v3 = vld [vmem:[#allocation8 + $0x10] ss:$20 sps:$4 sm:$0xff]   ;;  %v1012_v5 = vld [vmem:[#allocation8 + $0x38] ss:$20 sps:$4 sm:$0xff]   ;;  %v1017_v10 = vld [vmem:[#allocation8 + $0x100] ss:$20 sps:$4 sm:$0xff]  }
  0x5d   :  { %884 = vmatpush3.bf16.msra.mxu0 %v951_v7  ;;  %904 = vmatpush3.bf16.msra.mxu1 %v959_v12  ;;  %v1014_v7 = vld [vmem:[#allocation8 + $0x88] ss:$20 sps:$4 sm:$0xff]   ;;  %v1015_v8 = vld [vmem:[#allocation8 + $0xb0] ss:$20 sps:$4 sm:$0xff]   ;;  %v358_v12 = vlaneseq }
  0x5e   :  { %885 = vmatprep.subr.bf16.mxu0 %v1161_v0  ;;  %905 = vmatprep.subr.bf16.mxu1 %v1161_v0 }
  0x61   :  { %886 = vmatpush3.bf16.msra.mxu0 %v952_v9  ;;  %906 = vmatpush3.bf16.msra.mxu1 %v960_v14  ;;  %v1016_v9 = vld [vmem:[#allocation8 + $0xd8] ss:$20 sps:$4 sm:$0xff]  }
  0x62   :  { %887 = vmatprep.subr.bf16.mxu0 %v1161_v0  ;;  %907 = vmatprep.subr.bf16.mxu1 %v1161_v0 }
  0x65   :  { %888 = vmatpush3.bf16.msra.mxu0 %v953_v11  ;;  %908 = vmatpush3.bf16.msra.mxu1 %v961_v16  ;;  %v1018_v11 = vld [vmem:[#allocation8 + $0x128] ss:$20 sps:$4 sm:$0xff]  }
  0x66   :  { %889 = vmatprep.subr.bf16.mxu0 %v1161_v0  ;;  %909 = vmatprep.subr.bf16.mxu1 %v1161_v0 }
  0x69   :  { %890 = vmatpush3.bf16.msra.mxu0 %v954_v13  ;;  %910 = vmatpush3.bf16.msra.mxu1 %v962_v17  ;;  %v359_v13 = vshrl.u32 %v358_v12, 7 }
  0x6a   :  { %591 = vmatprep.subr.bf16.mxu0 %v965_v19  ;;  %632 = vmatprep.subr.bf16.mxu1 %v968_v20 }
  0x6b   :  { %v360_v14 = vsub.s32 0, %v359_v13  ;;  %v364_v16 = vsub.s32 1, %v359_v13  ;;  %v368_v17 = vsub.s32 2, %v359_v13  ;;  %v372_v20 = vsub.s32 3, %v359_v13 }
  0x6c   :  { %892 = vmatmul.mubr.bf16.vlgmr.msra.gmra.mrb[0].mxu0 %v81_v15  ;;  %v356_v15 = vld [vmem:[%s1324_s6] sm:$0x1f]  ;;  %s1164_s6 = smov [#allocation10]  }
  0x6d   :  { %592 = vmatpush1.bf16.msra.mxu0 %v963_v18  ;;  %623 = vmatprep.mubr.bf16.mxu0 %v1163_v58  ;;  %v361_v18 = vrot.slane %v356_v15, %v360_v14  ;;  %v365_v19 = vrot.slane %v356_v15, %v364_v16  ;;  %s779_s29 = sshll.u32 %s1164_s6, 4  ;;  %s780_s29 = int_to_ptr.vmem [resolvable:$true] %s779_s29 }
  0x6e   :  { %593 = vmatprep.subr.bf16.mxu0 %v971_v21  ;;  %s1123_s30 = scalar_lea.vmem %s780_s29, 512  ;;  %p1128_p5 = scmp.lt.s32.totalorder %s780_s29, %s780_s29 }
  0x6f   :  { %p1124_p4 = scmp.ne.s32.totalorder %s780_s29, %s1123_s30  ;;  %p1129_p6 = scmp.lt.s32.totalorder %s1123_s30, %s1123_s30 }
  0x71   :  { %594 = vmatpush1.bf16.msra.mxu0 %v969_v22  ;;  %v369_v22 = vrot.slane %v356_v15, %v368_v17  ;;  %p1130_p7 = por %p1129_p6, %p1128_p5 }
  0x72   :  { %595 = vmatprep.subr.bf16.mxu0 %v977_v23 }
  0x73   :  { %p1131_p8 = pnand %p1130_p7, %p1124_p4 }
  0x75   :  { %596 = vmatpush1.bf16.msra.mxu0 %v975_v24 }
  0x76   :  { %597 = vmatprep.subr.bf16.mxu0 %v983_v25 }
  0x79   :  { %598 = vmatpush1.bf16.msra.mxu0 %v981_v26 }
  0x7a   :  { %599 = vmatprep.subr.bf16.mxu0 %v989_v27  ;;  %v373_v27 = vrot.slane %v356_v15, %v372_v20 }
  0x7d   :  { %600 = vmatpush1.bf16.msra.mxu0 %v987_v28 }
  0x7e   :  { %601 = vmatprep.subr.bf16.mxu0 %v995_v29 }
  0x81   :  { %602 = vmatpush1.bf16.msra.mxu0 %v993_v30 }
  0x82   :  { %603 = vmatprep.subr.bf16.mxu0 %v1001_v31 }
  0x85   :  { %604 = vmatpush1.bf16.msra.mxu0 %v999_v32 }
  0x86   :  { %605 = vmatprep.subr.bf16.mxu0 %v1007_v54 }
  0x89   :  { %606 = vmatpush1.bf16.msra.mxu0 %v1005_v55 }
  0x8a   :  { %915 = vmatprep.subr.bf16.mxu0 %v1161_v0 }
 0x13f   :  { %v187_v34 = vpop.f32.mrb[0].mxu0 }
 0x140   :  { %v188_v35 = vadd.f32 %v790_v33, %v187_v34  ;;  %v893_v36 = vpop.f32.mrb[1].mxu0 }
 0x141   :  { %v190_v37 = vpop.f32.mrb[2].mxu0 }
 0x142   :  { %v193_v38 = vmax.f32 %v188_v35, 0.0  ;;  %v894_v39 = vpop.f32.mrb[3].mxu0  ;;  %v376_v37 = vsub.s32 4, %v359_v13 }
 0x144   :  { %v194_v41 = vpack.c.bf16 %v193_v38, %v193_v38  ;;  %v377_v38 = vrot.slane %v356_v15, %v376_v37 }
 0x146   :  { %912 = vmatmul.mubr.bf16.vlgmr.msra.gmra.mrb[0].mxu1 %v194_v41 }
 0x147   :  { %633 = vmatpush1.bf16.msra.mxu1 %v966_v40  ;;  %664 = vmatprep.mubr.bf16.mxu1 %v1163_v58  ;;  %v719_v40 = vand.u32 127, %v358_v12 }
 0x148   :  { %634 = vmatprep.subr.bf16.mxu1 %v974_v42 }
 0x149   :  { %vm720_vm1 = vcmp.lt.s32.totalorder %v719_v40, 51 }
 0x14b   :  { %635 = vmatpush1.bf16.msra.mxu1 %v972_v43 }
 0x14c   :  { %636 = vmatprep.subr.bf16.mxu1 %v980_v44 }
 0x14f   :  { %637 = vmatpush1.bf16.msra.mxu1 %v978_v45 }
 0x150   :  { %638 = vmatprep.subr.bf16.mxu1 %v986_v46 }
 0x153   :  { %639 = vmatpush1.bf16.msra.mxu1 %v984_v47 }
 0x154   :  { %640 = vmatprep.subr.bf16.mxu1 %v992_v48 }
 0x157   :  { %641 = vmatpush1.bf16.msra.mxu1 %v990_v49 }
 0x158   :  { %642 = vmatprep.subr.bf16.mxu1 %v998_v50 }
 0x15b   :  { %643 = vmatpush1.bf16.msra.mxu1 %v996_v51 }
 0x15c   :  { %644 = vmatprep.subr.bf16.mxu1 %v1004_v52 }
 0x15f   :  { %645 = vmatpush1.bf16.msra.mxu1 %v1002_v53 }
 0x160   :  { %646 = vmatprep.subr.bf16.mxu1 %v1010_v56 }
 0x163   :  { %647 = vmatpush1.bf16.msra.mxu1 %v1008_v57 }
 0x219   :  { %v300_v60 = vpop.f32.mrb[0].mxu1 }
 0x21a   :  { %v301_v61 = vadd.f32 %v799_v59, %v300_v60  ;;  %v913_v62 = vpop.f32.mrb[1].mxu1 }
 0x21b   :  { %v303_v63 = vpop.f32.mrb[2].mxu1 }
 0x21c   :  { %v306_v1 = vmax.f32 %v301_v61, 0.0  ;;  %v914_v2 = vpop.f32.mrb[3].mxu1 }
 0x21e   :  { %v307_v4 = vpack.c.bf16 %v306_v1, %v306_v1 }
 0x220   :  { %624 = vmatmul.mubr.bf16.vlgmr.msra.gmra.mrb[4].mxu0 %v307_v4  ;;  %665 = vmatmul.mubr.bf16.vlgmr.msra.gmra.mrb[4].mxu1 %v307_v4 }
 0x221   :  { %916 = vmatpush3.bf16.msra.mxu0 %v1011_v3  ;;  %931 = vmatprep.mubr.msk.bf16.mxu0 %vm1162_vm0, %v1161_v0 }
 0x222   :  { %917 = vmatprep.subr.bf16.mxu0 %v1161_v0 }
 0x225   :  { %918 = vmatpush3.bf16.msra.mxu0 %v1012_v5 }
 0x226   :  { %919 = vmatprep.subr.bf16.mxu0 %v1161_v0 }
 0x229   :  { %920 = vmatpush3.bf16.msra.mxu0 %v1013_v6 }
 0x22a   :  { %921 = vmatprep.subr.bf16.mxu0 %v1161_v0 }
 0x22d   :  { %922 = vmatpush3.bf16.msra.mxu0 %v1014_v7 }
 0x22e   :  { %923 = vmatprep.subr.bf16.mxu0 %v1161_v0 }
 0x231   :  { %924 = vmatpush3.bf16.msra.mxu0 %v1015_v8 }
 0x232   :  { %925 = vmatprep.subr.bf16.mxu0 %v1161_v0 }
 0x235   :  { %926 = vmatpush3.bf16.msra.mxu0 %v1016_v9 }
 0x236   :  { %927 = vmatprep.subr.bf16.mxu0 %v1161_v0 }
 0x239   :  { %928 = vmatpush3.bf16.msra.mxu0 %v1017_v10 }
 0x23a   :  { %929 = vmatprep.subr.bf16.mxu0 %v1161_v0 }
 0x23d   :  { %930 = vmatpush3.bf16.msra.mxu0 %v1018_v11 }
 0x240   :  { %932 = vmatmul.mubr.bf16.vlgmr.msra.gmra.mrb[8].mxu0 %v307_v4 }
 0x2f3   :  { %v625_v21 = vpop.f32.mrb[4].mxu0  ;;  %v666_v23 = vpop.f32.mrb[4].mxu1 }
 0x2f4   :  { %v626_v24 = vadd.f32 %v625_v21, %v361_v18  ;;  %v627_v25 = vpop.f32.mrb[5].mxu0  ;;  %v668_v0 = vpop.f32.mrb[5].mxu1  ;;  %v667_v32 = vadd.f32 %v666_v23, %v369_v22 }
 0x2f5   :  { %v628_v26 = vadd.f32 %v627_v25, %v365_v19  ;;  %v629_v28 = vpop.f32.mrb[6].mxu0  ;;  %v670_v29 = vpop.f32.mrb[6].mxu1  ;;  %v669_v34 = vadd.f32 %v668_v0, %v373_v27 }
 0x2f6   :  { %v630_v30 = vpop.f32.mrb[7].mxu0  ;;  %v671_v31 = vpop.f32.mrb[7].mxu1 }
 0x2f7   :  { %v713_v33 = vadd.f32 %v628_v26, %v626_v24 }
 0x2f9   :  { %v714_v35 = vadd.f32 %v713_v33, %v667_v32 }
 0x2fb   :  { %v715_v36 = vadd.f32 %v714_v35, %v669_v34 }
 0x2fd   :  { %v716_v41 = vmul.f32 0.25, %v715_v36 }
 0x313   :  { %v707_v39 = vpop.f32.mrb[8].mxu0 }
 0x314   :  { %v708_v42 = vadd.f32 %v707_v39, %v377_v38  ;;  %v933_v43 = vpop.f32.mrb[9].mxu0 }
 0x315   :  { %v710_v44 = vpop.f32.mrb[10].mxu0 }
 0x316   :  { %v717_v45 = vsub.f32 %v708_v42, %v716_v41  ;;  %v934_v46 = vpop.f32.mrb[11].mxu0 }
 0x318   :  { %v747_v47 = vadd.f32 %v717_v45, %v667_v32  ;;  %v721_v48 = vadd.f32 %v717_v45, %v626_v24  ;;  %v760_v49 = vadd.f32 %v717_v45, %v669_v34  ;;  %v734_v50 = vadd.f32 %v717_v45, %v628_v26 }
 0x31a   :  { %v748_v51 = vsel %vm720_vm1, %v747_v47, -1e+30  ;;  %v722_v52 = vsel %vm720_vm1, %v721_v48, -1e+30  ;;  %v761_v53 = vsel %vm720_vm1, %v760_v49, -1e+30 }
 0x31b   :  { %749 = vmax.xlane.f32.xlu1 %v748_v51  ;;  %723 = vmax.xlane.f32.xlu0 %v722_v52  ;;  %v735_v54 = vsel %vm720_vm1, %v734_v50, -1e+30 }
 0x31f   :  { %762 = vmax.xlane.f32.xlu1 %v761_v53  ;;  %736 = vmax.xlane.f32.xlu0 %v735_v54 }
 0x3a8   :  { %v750_v55 = vpop.xlane.xlu1 %749  ;;  %v724_v56 = vpop.xlane.xlu0 %723 }
 0x3a9   :  { %v751_v57 = vsub.f32 %v747_v47, %v750_v55  ;;  %v725_v58 = vsub.f32 %v721_v48, %v724_v56 }
 0x3ab   :  { %v726_v59 = vmul.f32 1.442695, %v725_v58  ;;  %v752_v60 = vmul.f32 1.442695, %v751_v57 }
 0x3ac   :  { %v763_v61 = vpop.xlane.xlu1 %762  ;;  %v737_v62 = vpop.xlane.xlu0 %736 }
 0x3ad   :  { %v764_v63 = vsub.f32 %v760_v49, %v763_v61  ;;  %v738_v1 = vsub.f32 %v734_v50, %v737_v62  ;;  %1019 = vpow2.f32 %v726_v59 }
 0x3ae   :  { %1021 = vpow2.f32 %v752_v60 }
 0x3af   :  { %v739_v2 = vmul.f32 1.442695, %v738_v1  ;;  %v765_v3 = vmul.f32 1.442695, %v764_v63 }
 0x3b1   :  { %1023 = vpow2.f32 %v739_v2 }
 0x3b2   :  { %1025 = vpow2.f32 %v765_v3 }
 0x3b7   :  { %v1020_v4 = vpop.eup %1019 }
 0x3b8   :  { %v728_v5 = vsel %vm720_vm1, %v1020_v4, 0.0  ;;  %v1022_v6 = vpop.eup %1021 }
 0x3b9   :  { %729 = vadd.xlane.f32.xlu0 %v728_v5  ;;  %v754_v8 = vsel %vm720_vm1, %v1022_v6, 0.0 }
 0x3bb   :  { %v1024_v7 = vpop.eup %1023 }
 0x3bc   :  { %v741_v9 = vsel %vm720_vm1, %v1024_v7, 0.0  ;;  %v1026_v10 = vpop.eup %1025 }
 0x3bd   :  { %755 = vadd.xlane.f32.xlu0 %v754_v8  ;;  %742 = vadd.xlane.f32.xlu1 %v741_v9  ;;  %v767_v11 = vsel %vm720_vm1, %v1026_v10, 0.0 }
 0x3c1   :  { %768 = vadd.xlane.f32.xlu1 %v767_v11 }
 0x446   :  { %v730_v12 = vpop.xlane.xlu0 %729 }
 0x447   :  { %1027 = vrcp.f32 %v730_v12 }
 0x44a   :  { %v743_v13 = vpop.xlane.xlu1 %742  ;;  %v756_v14 = vpop.xlane.xlu0 %755 }
 0x44b   :  { %1029 = vrcp.f32 %v743_v13 }
 0x44c   :  { %1031 = vrcp.f32 %v756_v14 }
 0x44e   :  { %v769_v15 = vpop.xlane.xlu1 %768 }
 0x44f   :  { %1033 = vrcp.f32 %v769_v15 }
 0x451   :  { %v1028_v16 = vpop.eup %1027 }
 0x452   :  { %v732_v17 = vmul.f32 %v1028_v16, %v728_v5 }
 0x454   :  { %733 = vst [vmem:[#allocation10] sm:$0xff] %v732_v17 }
 0x455   :  { %v1030_v18 = vpop.eup %1029 }
 0x456   :  { %v1032_v19 = vpop.eup %1031  ;;  %v745_v20 = vmul.f32 %v1030_v18, %v741_v9 }
 0x457   :  { %v758_v21 = vmul.f32 %v1032_v19, %v754_v8 }
 0x458   :  { %746 = vst [vmem:[#allocation10 + $0x8] sm:$0xff] %v745_v20 }
 0x459   :  { %v1034_v22 = vpop.eup %1033  ;;  %759 = vst [vmem:[#allocation10 + $0x10] sm:$0xff] %v758_v21 }
 0x45a   :  { %v771_v23 = vmul.f32 %v1034_v22, %v767_v11 }
 0x45c   :  { %772 = vst [vmem:[#allocation10 + $0x18] sm:$0xff] %v771_v23 }
 0x45d   :  { %1134 = shalt.err (!%p1131_p8)
}
 0x45e   :  { %s1135_s10 = scalar_lea.hbm %s1325_s7, 512 }
 0x45f   :  { %p1136_p9 = scmp.ne.s32.totalorder %s1325_s7, %s1135_s10  ;;  %p1139_p10 = scmp.lt.u32.totalorder %s1135_s10, %s1325_s7 }
 0x461   :  { %p1141_p11 = pnand %p1139_p10, %p1136_p9 }
 0x463   :  { %1144 = shalt.err (!%p1141_p11)
}
 0x464   :  { %782 = dma.vmem_to_hbm [thread:$0]  %s780_s29, 512, %s1325_s7, [#allocation4]  }
 0x465   :  { %1151 = dma.done.wait [#allocation4], 512  }
 0x466   :  { %1152 = vsyncadd [#allocation4], 4294966784 }
 0x467   :  { %786 = vsyncpa [#allocation3], 1 }
 0x468   :  { %787 = vsyncpa [#allocation6], 1 }
 0x469   :  { %788 = vsyncpa [#allocation9], 1 }
 0x46a   :  { %789 = vsyncpa [#allocation4], 1 }

</bundles_post_ra>
